<compile_context>
chip_gen: v5e
topology: v5e:2x2
jax: 0.10.0
libtpu: 0.0.40
codegen_flags: <defaults>
</compile_context>

<pallas_src>
import functools

import jax
import jax.numpy as jnp
from jax.experimental import pallas as pl
from jax.experimental.pallas import tpu as pltpu


def _round_up(x: int, m: int) -> int:
    return (x + m - 1) // m * m


def _log_sigmoid(x):
    # numerically stable logsigmoid(x) = min(x, 0) - log1p(exp(-|x|))
    return jnp.minimum(x, 0.0) - jnp.log1p(jnp.exp(-jnp.abs(x)))


def _skipgram_kernel(tgt_ref, pos_ref, neg_ref, out_ref, *, K: int, D: int):
    tgt = tgt_ref[...].astype(jnp.float32)          # (TB, D)
    pos = pos_ref[...].astype(jnp.float32)          # (TB, D)
    neg = neg_ref[...].astype(jnp.float32)          # (TB, K*D) lane-dense block

    # positive_score = sum(target * positive_context, dim=1)        -> (TB, 1)
    pos_score = jnp.sum(tgt * pos, axis=1, keepdims=True)

    # Negative path (K-sum rewrite): sum the K negatives first via static lane
    # slices of the flattened block, then one row-dot.  Algebraically equal to
    # sum_k <neg_k, tgt> because the reference applies logsigmoid AFTER the
    # K-sum (fp32 reassociation only; within 1e-5 of the reference).
    neg_sum = neg[:, 0:D]
    for k in range(1, K):
        neg_sum = neg_sum + neg[:, k * D:(k + 1) * D]
    neg_score = jnp.sum(tgt * neg_sum, axis=1, keepdims=True)       # (TB, 1)

    # per-row contribution: logsigmoid(pos_score) + logsigmoid(-neg_score)
    out_ref[...] = _log_sigmoid(pos_score) + _log_sigmoid(-neg_score)


# Double-buffered VMEM working-set budget.  Conservative enough to fit the
# v7x 64 MiB physical VMEM with ample margin (and trivially v5e/v6e 128 MiB).
_VMEM_WORKING_SET_BUDGET = 24 * 1024 * 1024


def _pick_tile_b(B: int, D: int, K: int, itemsize: int) -> int:
    if B < 8:
        return B  # block second-to-last dim == full array dim -> allowed
    pad = lambda n: _round_up(n, 128)
    # VMEM footprint per batch row AFTER lane padding (tgt + pos + flattened
    # negatives + f32 per-row output), x2 for double buffering.
    row_vmem = 2 * (itemsize * (2 * pad(D) + pad(K * D)) + 4 * 128)
    tile_b = max(8, (_VMEM_WORKING_SET_BUDGET // row_vmem) // 8 * 8)
    # Keep >=2 grid steps when the batch allows it, so ("parallel",) can shard
    # tiles across v7x's two TensorCores.
    if B > 8:
        tile_b = min(tile_b, _round_up(pl.cdiv(B, 2), 8))
    tile_b = min(tile_b, _round_up(B, 8))
    return tile_b


def skipgram_loss(tgt_emb, pos_emb, neg_emb, *, tile_b=None):
    """tgt_emb: (B, D), pos_emb: (B, D), neg_emb: (B, K, D) -> scalar loss."""
    B, D = tgt_emb.shape
    K = neg_emb.shape[1]
    itemsize = jnp.dtype(neg_emb.dtype).itemsize

    # Lane-dense 2D negatives stream (free, contiguous reshape).
    neg_flat = neg_emb.reshape(B, K * D)

    if tile_b is None:
        tile_b = _pick_tile_b(B, D, K, itemsize)
    if B >= 8:
        tile_b = max(8, min((tile_b // 8) * 8, _round_up(B, 8)))
    else:
        tile_b = B

    grid = (pl.cdiv(B, tile_b),)   # no wrapper padding: partial tail block

    # Advisory cost hint: true HBM bytes of the kernel's streams + flops.
    cost = pl.CostEstimate(
        flops=2 * B * (K + 2) * D,
        transcendentals=4 * B,
        bytes_accessed=B * (itemsize * (2 * D + K * D) + 4),
    )

    kernel = functools.partial(_skipgram_kernel, K=K, D=D)

    per_row = pl.pallas_call(
        kernel,
        out_shape=jax.ShapeDtypeStruct((B, 1), jnp.float32),
        grid_spec=pltpu.PrefetchScalarGridSpec(
            num_scalar_prefetch=0,
            grid=grid,
            in_specs=[
                pl.BlockSpec((tile_b, D), lambda i: (i, 0)),
                pl.BlockSpec((tile_b, D), lambda i: (i, 0)),
                pl.BlockSpec((tile_b, K * D), lambda i: (i, 0)),
            ],
            out_specs=pl.BlockSpec((tile_b, 1), lambda i: (i, 0)),
        ),
        compiler_params=pltpu.CompilerParams(
            dimension_semantics=("parallel",),      # shard tiles over TCs (v7x)
            vmem_limit_bytes=48 * 1024 * 1024,
        ),
        cost_estimate=cost,
    )(tgt_emb, pos_emb, neg_flat)

    # loss = -(sum of per-row contributions) / B   (output has exactly B rows)
    return -jnp.sum(per_row[:, 0]) / B


class SkipGramJAX:
    """JAX/Pallas re-implementation of the PyTorch SkipGram module."""

    def __init__(self, vocabulary_size: int, embedding_dimension: int, key):
        self.vocabulary_size = vocabulary_size
        self.embedding_dimension = embedding_dimension
        r = 0.5 / embedding_dimension
        # target_embeddings ~ U(-r, r); context_embeddings initialized to 0
        # (matches the PyTorch module's _initialize_embeddings).
        self.target_embeddings = jax.random.uniform(
            key, (vocabulary_size, embedding_dimension),
            minval=-r, maxval=r, dtype=jnp.float32)
        self.context_embeddings = jnp.zeros(
            (vocabulary_size, embedding_dimension), dtype=jnp.float32)

    def forward(self, target_block, positive_context_block, negative_context_blocks,
                *, stream_dtype=jnp.float32):
        # Embedding lookups (gather) done in plain JAX; the math is in the kernel.
        # Pass stream_dtype=jnp.bfloat16 to halve HBM bytes of the gathered
        # streams (kernel upcasts to f32 internally; tiny numerics deviation).
        # TODO(synk): in-kernel gather via scalar-prefetched indices + per-row HBM
        # DMAs to remove the gathered (B, K, D) HBM intermediate entirely.
        tgt_emb = jnp.take(self.target_embeddings, target_block, axis=0
                           ).astype(stream_dtype)                                  # (B, D)
        pos_emb = jnp.take(self.context_embeddings, positive_context_block, axis=0
                           ).astype(stream_dtype)                                  # (B, D)
        neg_emb = jnp.take(self.context_embeddings, negative_context_blocks, axis=0
                           ).astype(stream_dtype)                                  # (B, K, D)
        return skipgram_loss(tgt_emb, pos_emb, neg_emb)


def _reference_loss(tgt_emb, pos_emb, neg_emb):
    """Pure-JAX reference mirroring the PyTorch forward."""
    b = tgt_emb.shape[0]
    tgt_emb = tgt_emb.astype(jnp.float32)
    pos_emb = pos_emb.astype(jnp.float32)
    neg_emb = neg_emb.astype(jnp.float32)
    pos_score = jnp.sum(tgt_emb * pos_emb, axis=1)
    pos_target = jax.nn.log_sigmoid(pos_score)
    neg_score = jnp.einsum('bkd,bd->bk', neg_emb, tgt_emb)
    neg_score = jnp.sum(neg_score, axis=1)
    neg_target = jax.nn.log_sigmoid(-neg_score)
    return -jnp.sum(pos_target + neg_target) / b


if __name__ == "__main__":
    vocabulary_size = 64
    embedding_dimension = 32
    batch_size = 8
    num_negative_samples = 4

    root = jax.random.PRNGKey(0)
    k_emb, k_t, k_p, k_n, k_a, k_b, k_c, k_d, k_e, k_f = jax.random.split(root, 10)

    model = SkipGramJAX(vocabulary_size, embedding_dimension, k_emb)

    target_block = jax.random.randint(k_t, (batch_size,), 0, vocabulary_size)
    positive_context_block = jax.random.randint(k_p, (batch_size,), 0, vocabulary_size)
    negative_context_blocks = jax.random.randint(
        k_n, (batch_size, num_negative_samples), 0, vocabulary_size)

    # --- check 1: full module forward (context embeddings zero-initialized,
    # matching the PyTorch module); single-tile grid.
    loss = model.forward(target_block, positive_context_block, negative_context_blocks)
    loss = jax.block_until_ready(loss)
    tgt_emb = jnp.take(model.target_embeddings, target_block, axis=0)
    pos_emb = jnp.take(model.context_embeddings, positive_context_block, axis=0)
    neg_emb = jnp.take(model.context_embeddings, negative_context_blocks, axis=0)
    ref = _reference_loss(tgt_emb, pos_emb, neg_emb)
    assert jnp.allclose(loss, ref, atol=1e-5, rtol=1e-5), (loss, ref)

    # --- check 2: random dense embeddings with an explicit small tile
    # (tile_b=8 -> grid=(3,)) exercising the partial tail block (B=20, no pad).
    B2, K2, D2 = 20, 3, 48
    tgt2 = 0.3 * jax.random.normal(k_a, (B2, D2), dtype=jnp.float32)
    pos2 = 0.3 * jax.random.normal(k_b, (B2, D2), dtype=jnp.float32)
    neg2 = 0.3 * jax.random.normal(k_c, (B2, K2, D2), dtype=jnp.float32)
    loss2 = jax.block_until_ready(skipgram_loss(tgt2, pos2, neg2, tile_b=8))
    ref2 = _reference_loss(tgt2, pos2, neg2)
    assert jnp.allclose(loss2, ref2, atol=1e-5, rtol=1e-5), (loss2, ref2)

    # --- check 3: bf16 gathered streams with the auto tile picker
    # (B=64 -> tile_b=32, grid=(2,)); reference uses the same bf16-rounded
    # inputs so only the kernel's reassociation differs.
    B3, K3, D3 = 64, 4, 32
    tgt3 = (0.3 * jax.random.normal(k_d, (B3, D3), dtype=jnp.float32)).astype(jnp.bfloat16)
    pos3 = (0.3 * jax.random.normal(k_e, (B3, D3), dtype=jnp.float32)).astype(jnp.bfloat16)
    neg3 = (0.3 * jax.random.normal(k_f, (B3, K3, D3), dtype=jnp.float32)).astype(jnp.bfloat16)
    loss3 = jax.block_until_ready(skipgram_loss(tgt3, pos3, neg3))
    ref3 = _reference_loss(tgt3, pos3, neg3)
    assert jnp.allclose(loss3, ref3, atol=1e-5, rtol=1e-5), (loss3, ref3)

    print("KERNEL_OK")
</pallas_src>

<mosaic_0001>
module attributes {stable_mosaic.version = 11 : i64} {
  func.func @_skipgram_kernel(%arg0: i32, %arg1: memref<8x32xf32, #tpu.memory_space<vmem>>, %arg2: memref<8x32xf32, #tpu.memory_space<vmem>>, %arg3: memref<8x128xf32, #tpu.memory_space<vmem>>, %arg4: memref<8x1xf32, #tpu.memory_space<vmem>>) attributes {dimension_semantics = [#tpu.dimension_semantics<parallel>], iteration_bounds = array<i64: 1>, scalar_prefetch = 0 : i64, scratch_operands = 0 : i64, tpu.core_type = #tpu.core_type<tc>, window_params = [{transform_indices = @transform_0, window_bounds = array<i64: 8, 32>}, {transform_indices = @transform_1, window_bounds = array<i64: 8, 32>}, {transform_indices = @transform_2, window_bounds = array<i64: 8, 128>}, {transform_indices = @transform_3, window_bounds = array<i64: 8, 1>}]} {
    %c0 = arith.constant 0 : index
    %c0_0 = arith.constant 0 : index
    %0 = vector.load %arg1[%c0, %c0_0] : memref<8x32xf32, #tpu.memory_space<vmem>>, vector<8x32xf32>
    %c0_1 = arith.constant 0 : index
    %c0_2 = arith.constant 0 : index
    %1 = vector.load %arg2[%c0_1, %c0_2] : memref<8x32xf32, #tpu.memory_space<vmem>>, vector<8x32xf32>
    %c0_3 = arith.constant 0 : index
    %c0_4 = arith.constant 0 : index
    %2 = vector.load %arg3[%c0_3, %c0_4] : memref<8x128xf32, #tpu.memory_space<vmem>>, vector<8x128xf32>
    %3 = arith.mulf %0, %1 : vector<8x32xf32>
    %cst = arith.constant dense<0.000000e+00> : vector<8xf32>
    %4 = vector.multi_reduction <add>, %3, %cst [1] : vector<8x32xf32> to vector<8xf32>
    %5 = vector.shape_cast %4 : vector<8xf32> to vector<8x1xf32>
    %6 = vector.extract_strided_slice %2 {offsets = [0, 0], sizes = [8, 32], strides = [1, 1]} : vector<8x128xf32> to vector<8x32xf32>
    %7 = vector.extract_strided_slice %2 {offsets = [0, 32], sizes = [8, 32], strides = [1, 1]} : vector<8x128xf32> to vector<8x32xf32>
    %8 = arith.addf %6, %7 : vector<8x32xf32>
    %9 = vector.extract_strided_slice %2 {offsets = [0, 64], sizes = [8, 32], strides = [1, 1]} : vector<8x128xf32> to vector<8x32xf32>
    %10 = arith.addf %8, %9 : vector<8x32xf32>
    %11 = vector.extract_strided_slice %2 {offsets = [0, 96], sizes = [8, 32], strides = [1, 1]} : vector<8x128xf32> to vector<8x32xf32>
    %12 = arith.addf %10, %11 : vector<8x32xf32>
    %13 = arith.mulf %0, %12 : vector<8x32xf32>
    %cst_5 = arith.constant dense<0.000000e+00> : vector<8xf32>
    %14 = vector.multi_reduction <add>, %13, %cst_5 [1] : vector<8x32xf32> to vector<8xf32>
    %15 = vector.shape_cast %14 : vector<8xf32> to vector<8x1xf32>
    %cst_6 = arith.constant 0.000000e+00 : f32
    %16 = vector.broadcast %cst_6 : f32 to vector<8x1xf32>
    %17 = arith.minimumf %5, %16 : vector<8x1xf32>
    %18 = math.absf %5 : vector<8x1xf32>
    %cst_7 = arith.constant 0.000000e+00 : f32
    %19 = vector.broadcast %cst_7 : f32 to vector<8x1xf32>
    %20 = arith.subf %19, %18 : vector<8x1xf32>
    %21 = math.exp %20 : vector<8x1xf32>
    %22 = math.log1p %21 : vector<8x1xf32>
    %23 = arith.subf %17, %22 : vector<8x1xf32>
    %cst_8 = arith.constant 0.000000e+00 : f32
    %24 = vector.broadcast %cst_8 : f32 to vector<8x1xf32>
    %25 = arith.subf %24, %15 : vector<8x1xf32>
    %cst_9 = arith.constant 0.000000e+00 : f32
    %26 = vector.broadcast %cst_9 : f32 to vector<8x1xf32>
    %27 = arith.minimumf %25, %26 : vector<8x1xf32>
    %28 = math.absf %25 : vector<8x1xf32>
    %cst_10 = arith.constant 0.000000e+00 : f32
    %29 = vector.broadcast %cst_10 : f32 to vector<8x1xf32>
    %30 = arith.subf %29, %28 : vector<8x1xf32>
    %31 = math.exp %30 : vector<8x1xf32>
    %32 = math.log1p %31 : vector<8x1xf32>
    %33 = arith.subf %27, %32 : vector<8x1xf32>
    %34 = arith.addf %23, %33 : vector<8x1xf32>
    %c0_11 = arith.constant 0 : index
    %c0_12 = arith.constant 0 : index
    %35 = vector.load %arg4[%c0_11, %c0_12] : memref<8x1xf32, #tpu.memory_space<vmem>>, vector<8x1xf32>
    tpu.vector_store %arg4[%c0_11, %c0_12], %34 {strides = array<i32>} : memref<8x1xf32, #tpu.memory_space<vmem>>, vector<8x1xf32>,
    return
  }
  func.func @transform_0(%arg0: i32) -> (i32, i32) {
    %c0_i32 = arith.constant 0 : i32
    %c0_i32_0 = arith.constant 0 : i32
    return %arg0, %c0_i32 : i32, i32
  }
  func.func @transform_1(%arg0: i32) -> (i32, i32) {
    %c0_i32 = arith.constant 0 : i32
    %c0_i32_0 = arith.constant 0 : i32
    return %arg0, %c0_i32 : i32, i32
  }
  func.func @transform_2(%arg0: i32) -> (i32, i32) {
    %c0_i32 = arith.constant 0 : i32
    %c0_i32_0 = arith.constant 0 : i32
    return %arg0, %c0_i32 : i32, i32
  }
  func.func @transform_3(%arg0: i32) -> (i32, i32) {
    %c0_i32 = arith.constant 0 : i32
    %c0_i32_0 = arith.constant 0 : i32
    return %arg0, %c0_i32 : i32, i32
  }
}

</mosaic_0001>

<bundles_post_ra>
// kernel: tpu_custom_call.1
= control target key start
LH: loop header
LB: loop body
LE: loop exit
PB: predicated region body
PF: predicated region fallthrough
CT: control target
= control target key end

     0   :  { %8 = vsyncpa [#allocation3], 0  ;;  %s250_s0 = inlined_call_operand.hbm [shape: f32[8,32], index: 0, kind: input, shape index: {}]   ;;  %s251_s1 = inlined_call_operand.hbm [shape: f32[8,32], index: 1, kind: input, shape index: {}]   ;;  %s252_s2 = inlined_call_operand.hbm [shape: f32[8,128], index: 2, kind: input, shape index: {}]   ;;  %s253_s3 = inlined_call_operand.vmem [shape: f32[8,1], index: 3, kind: output, shape index: {}]  }
   0x1   :  { %9 = vsyncpa [#allocation5], 0  ;;  %s26_s14 = sshll.u32 %s251_s1, 4  ;;  %s210_s15 = smov [#allocation4]   ;;  %s27_s14 = int_to_ptr.hbm [resolvable:$true] %s26_s14 }
   0x2   :  { %s28_s16 = sshll.u32 %s210_s15, 4  ;;  %s15_s19 = sshll.u32 %s250_s0, 4  ;;  %s29_s16 = int_to_ptr.vmem [resolvable:$true] %s28_s16  ;;  %s16_s19 = int_to_ptr.hbm [resolvable:$true] %s15_s19 }
   0x3   :  { %31 = dma.hbm_to_vmem [thread:$0]  %s27_s14, 128, %s29_s16, [#allocation5]  }
   0x4   :  { %s211_s20 = smov [#allocation2]   ;;  %s37_s24 = sshll.u32 %s252_s2, 4  ;;  %s38_s24 = int_to_ptr.hbm [resolvable:$true] %s37_s24 }
   0x5   :  { %s17_s21 = sshll.u32 %s211_s20, 4  ;;  %s212_s1 = smov [#allocation6]   ;;  %s18_s21 = int_to_ptr.vmem [resolvable:$true] %s17_s21 }
   0x6   :  { %20 = dma.hbm_to_vmem [thread:$0]  %s16_s19, 128, %s18_s21, [#allocation3]  }
   0x7   :  { %s39_s25 = sshll.u32 %s212_s1, 4  ;;  %s40_s25 = int_to_ptr.vmem [resolvable:$true] %s39_s25 }
   0x8   :  { %42 = dma.hbm_to_vmem [thread:$0]  %s38_s24, 128, %s40_s25, [#allocation5]  }
   0x9   :  { %206 = dma.done.wait [#allocation3], 128  }
   0xa   :  { %207 = vsyncadd [#allocation3], 4294967168 }
   0xb   :  { %208 = dma.done.wait [#allocation5], 256  }
   0xc   :  { %209 = vsyncadd [#allocation5], 4294967040  ;;  %v57_v0 = vld [vmem:[#allocation6] sm:$0xff]  ;;  %v55_v1 = vld [vmem:[#allocation2] sm:$0xff]  ;;  %vm59_vm0 = vcmask 261120   ;;  %s213_s0 = smov 96  }
   0xd   :  { %v56_v2 = vld [vmem:[#allocation4] sm:$0xff]  ;;  %64 = vrot.lane.b32.xlu0 %v57_v0, %s213_s0  ;;  %s214_s26 = smov 32   ;;  %s215_s2 = smov 64   ;;  %vm112_vm3 = vcmask 7168  }
   0xe   :  { %72 = vrot.lane.b32.xlu1 %v57_v0, %s214_s26  ;;  %v58_v3 = vmul.f32 %v56_v2, %v55_v1 }
  0x10   :  { %v60_v4 = vsel %vm59_vm0, %v58_v3, 0.0 }
  0x11   :  { %61 = vadd.xlane.f32.xlu2 %v60_v4 }
  0x15   :  { %68 = vrot.lane.b32.xlu0 %v57_v0, %s215_s2 }
  0x7f   :  { %v65_v5 = vpop.permute.xlu0 %64 }
  0x80   :  { %v67_v6 = vadd.f32 %v65_v5, %v57_v0  ;;  %v73_v8 = vpop.permute.xlu1 %72 }
  0x84   :  { %v62_v13 = vpop.xlane.xlu2 %61 }
  0x85   :  { %v81_v14 = vand.u32 2147483647, %v62_v13  ;;  %v80_v36 = vmin.f32 %v62_v13, 0.0 }
  0x87   :  { %v69_v7 = vpop.permute.xlu0 %68  ;;  %v82_v15 = vsub.f32 0.0, %v81_v14 }
  0x88   :  { %v71_v9 = vadd.f32 %v69_v7, %v67_v6 }
  0x89   :  { %v83_v16 = vmul.f32 1.442695, %v82_v15 }
  0x8a   :  { %v75_v10 = vadd.f32 %v73_v8, %v71_v9 }
  0x8b   :  { %126 = vpow2.f32 %v83_v16 }
  0x8c   :  { %v76_v11 = vmul.f32 %v75_v10, %v55_v1 }
  0x8e   :  { %v77_v12 = vsel %vm59_vm0, %v76_v11, 0.0 }
  0x8f   :  { %78 = vadd.xlane.f32.xlu1 %v77_v12 }
  0x91   :  { %v127_v20 = vpop.eup %126 }
  0x92   :  { %v85_v23 = vadd.f32 1.0, %v127_v20  ;;  %v88_v24 = vmul.f32 -0.5, %v127_v20  ;;  %v91_v30 = vand.u32 2147483647, %v127_v20 }
  0x94   :  { %v89_v27 = vadd.f32 1.0, %v88_v24  ;;  %vm92_vm1 = vcmp.lt.f32.partialorder %v91_v30, 0.0004427343 }
  0x96   :  { %v90_v32 = vmul.f32 %v127_v20, %v89_v27 }
 0x102   :  { %v79_v17 = vpop.xlane.xlu1 %78 }
 0x103   :  { %v95_v18 = vsub.f32 0.0, %v79_v17 }
 0x105   :  { %v97_v19 = vand.u32 2147483647, %v95_v18  ;;  %v96_v40 = vmin.f32 %v95_v18, 0.0 }
 0x107   :  { %v98_v21 = vsub.f32 0.0, %v97_v19 }
 0x109   :  { %v99_v22 = vmul.f32 1.442695, %v98_v21 }
 0x10b   :  { %128 = vpow2.f32 %v99_v22 }
 0x10c   :  { %130 = vlog2.f32 %v85_v23 }
 0x111   :  { %v129_v25 = vpop.eup %128 }
 0x112   :  { %v101_v26 = vadd.f32 1.0, %v129_v25  ;;  %v104_v28 = vmul.f32 -0.5, %v129_v25  ;;  %v131_v29 = vpop.eup %130  ;;  %v107_v34 = vand.u32 2147483647, %v129_v25 }
 0x113   :  { %v87_v31 = vmul.f32 0.6931472, %v131_v29 }
 0x114   :  { %132 = vlog2.f32 %v101_v26  ;;  %v105_v33 = vadd.f32 1.0, %v104_v28  ;;  %vm108_vm2 = vcmp.lt.f32.partialorder %v107_v34, 0.0004427343 }
 0x115   :  { %v93_v37 = vsel %vm92_vm1, %v90_v32, %v87_v31 }
 0x116   :  { %v106_v39 = vmul.f32 %v129_v25, %v105_v33  ;;  %v94_v42 = vsub.f32 %v80_v36, %v93_v37 }
 0x11a   :  { %v133_v35 = vpop.eup %132 }
 0x11b   :  { %v103_v38 = vmul.f32 0.6931472, %v133_v35 }
 0x11d   :  { %v109_v41 = vsel %vm108_vm2, %v106_v39, %v103_v38 }
 0x11e   :  { %v110_v43 = vsub.f32 %v96_v40, %v109_v41 }
 0x120   :  { %v111_v44 = vadd.f32 %v110_v43, %v94_v42 }
 0x122   :  { %113 = vst.msk [vmem:[%s253_s3] sm:$0xff] %vm112_vm3, %v111_v44 }
 0x123   :  { %118 = vsyncpa [#allocation3], 1 }
 0x124   :  { %119 = vsyncpa [#allocation5], 1 }

</bundles_post_ra>
